<compile_context>
chip_gen: v5e
topology: v5e:2x2
jax: 0.10.0
libtpu: 0.0.40
codegen_flags: <defaults>
</compile_context>

<pallas_src>
import functools

import jax
import jax.numpy as jnp
from jax.experimental import pallas as pl
from jax.experimental.pallas import tpu as pltpu


def _infonce_kernel(anchor_ref, positive_ref, negatives_ref, out_ref,
                    m_ref, s_ref, *, temperature: float, batch_size: int,
                    num_negatives: int, block_b: int, block_n: int):
    i = pl.program_id(0)          # batch block (parallel)
    j = pl.program_id(1)          # negatives block (innermost, arbitrary)

    eps = jnp.float32(1e-12)      # matches F.normalize default eps
    eps_sq = eps * eps            # clamp on sumsq == clamp on the norm
    inv_t = jnp.float32(1.0 / temperature)

    @pl.when(j == 0)
    def _init():
        m_ref[...] = jnp.full(m_ref.shape, -jnp.inf, dtype=jnp.float32)
        s_ref[...] = jnp.zeros(s_ref.shape, dtype=jnp.float32)

    # Fold 1/||a|| and 1/temperature into the anchor once (small tensor).
    a = anchor_ref[...].astype(jnp.float32)                            # (TB,D)
    a_ss = jnp.sum(a * a, axis=-1, keepdims=True)                      # (TB,1)
    a_scaled = a * (jax.lax.rsqrt(jnp.maximum(a_ss, eps_sq)) * inv_t)  # (TB,D)

    # Negative scores for this N tile: VPU multiply + lane reduce; 1/||n||
    # folded into the (TB, TN) scores, never into a normalized copy of n.
    n = negatives_ref[...].astype(jnp.float32)                      # (TB,TN,D)
    n_ss = jnp.sum(n * n, axis=-1)                                   # (TB,TN)
    raw = jnp.sum(a_scaled[:, None, :] * n, axis=-1)                 # (TB,TN)
    neg = raw * jax.lax.rsqrt(jnp.maximum(n_ss, eps_sq))             # (TB,TN)

    # Mask padded negative columns of a ragged last N block (select => any
    # garbage/NaN in the padded region cannot leak into real lanes).
    col = j * block_n + jax.lax.broadcasted_iota(jnp.int32, neg.shape, 1)
    neg = jnp.where(col < num_negatives, neg, jnp.float32(-jnp.inf))

    # Online logsumexp over the negatives (running m / sumexp per row).
    bm = jnp.max(neg, axis=-1, keepdims=True)                        # (TB,1)
    m_new = jnp.maximum(m_ref[...], bm)
    alpha = jnp.exp(m_ref[...] - m_new)                              # 0 at j==0
    s_ref[...] = alpha * s_ref[...] + jnp.sum(jnp.exp(neg - m_new),
                                              axis=-1, keepdims=True)
    m_ref[...] = m_new

    @pl.when(j == pl.num_programs(1) - 1)
    def _finalize():
        # Positive score: <a_hat, p_hat> / T (fold 1/||p|| into the scalar).
        p = positive_ref[...].astype(jnp.float32)                    # (TB,D)
        p_ss = jnp.sum(p * p, axis=-1, keepdims=True)
        pos = (jnp.sum(a_scaled * p, axis=-1, keepdims=True)
               * jax.lax.rsqrt(jnp.maximum(p_ss, eps_sq)))           # (TB,1)

        # Combine pos with the negatives' running logsumexp:
        #   loss_i = logsumexp([pos_i, neg_i...]) - pos_i
        mm = jnp.maximum(m_ref[...], pos)
        total = jnp.exp(pos - mm) + s_ref[...] * jnp.exp(m_ref[...] - mm)
        per_row = mm + jnp.log(total) - pos                          # (TB,1)

        # Mask padded rows of a ragged last batch block.
        row = i * block_b + jax.lax.broadcasted_iota(jnp.int32,
                                                     per_row.shape, 0)
        per_row = jnp.where(row < batch_size, per_row, jnp.float32(0.0))

        # Per-batch-block partial sum (no cross-block scratch accumulation,
        # so the batch axis can be sharded across TensorCores).
        out_ref[...] = jnp.sum(per_row, axis=0, keepdims=True)       # (1,1)


def _sublane_multiple(itemsize: int) -> int:
    # min sublane tile: f32 -> 8, bf16 -> 16, int8/fp8 -> 32
    return {4: 8, 2: 16, 1: 32}.get(itemsize, 8)


def _default_vmem_limit_bytes() -> int:
    """~75% of physical VMEM: ~96 MiB on v5e/v6e (128 MiB), ~48 MiB on v7x."""
    cap = 64 << 20
    try:
        cap = int(getattr(pltpu.get_tpu_info(), "vmem_capacity_bytes", cap))
    except Exception:
        pass
    return max(32 << 20, (cap * 3) // 4)


def _choose_blocks(B, N, D, itemsize, vmem_limit_bytes):
    """Pick (block_b, block_n) so that one double-buffered negatives tile plus
    ~3 f32 temporaries of the same element count fit under the VMEM limit."""
    sub = _sublane_multiple(itemsize)
    # Small batches run as a single block (full-dim blocks are always legal);
    # large batches use a fixed 64-row tile (multiple of 8/16/32).
    block_b = B if B <= 64 else 64

    budget = int(vmem_limit_bytes * 0.8)
    # bytes/elem: 2 buffers of the input dtype + ~3 f32 temporaries.
    elems = max(1, budget // (2 * itemsize + 12))
    bn = elems // max(1, block_b * D)
    if bn >= N:
        block_n = N                       # full extent, always legal
    else:
        block_n = max(sub, (bn // sub) * sub)
        block_n = min(block_n, N)         # if clipped to N it is full-extent
    return block_b, block_n


def infonce_loss(anchor, positive, negatives, temperature: float = 0.07,
                 block_b: int | None = None, block_n: int | None = None,
                 vmem_limit_bytes: int | None = None):
    """Pallas InfoNCE loss. anchor/positive: (B, D); negatives: (B, N, D)."""
    B, D = anchor.shape
    _, N, _ = negatives.shape
    itemsize = jnp.dtype(negatives.dtype).itemsize
    if vmem_limit_bytes is None:
        vmem_limit_bytes = _default_vmem_limit_bytes()
    auto_bb, auto_bn = _choose_blocks(B, N, D, itemsize, vmem_limit_bytes)
    block_b = auto_bb if block_b is None else block_b
    block_n = auto_bn if block_n is None else block_n

    num_b_blocks = pl.cdiv(B, block_b)
    num_n_blocks = pl.cdiv(N, block_n)

    kernel = functools.partial(
        _infonce_kernel, temperature=float(temperature), batch_size=B,
        num_negatives=N, block_b=block_b, block_n=block_n)

    partial_sums = pl.pallas_call(
        kernel,
        out_shape=jax.ShapeDtypeStruct((num_b_blocks, 1), jnp.float32),
        grid=(num_b_blocks, num_n_blocks),
        in_specs=[
            pl.BlockSpec((block_b, D), lambda i, j: (i, 0)),
            pl.BlockSpec((block_b, D), lambda i, j: (i, 0)),
            pl.BlockSpec((block_b, block_n, D), lambda i, j: (i, j, 0)),
        ],
        out_specs=pl.BlockSpec((1, 1), lambda i, j: (i, 0)),
        scratch_shapes=[pltpu.VMEM((block_b, 1), jnp.float32),   # running max
                        pltpu.VMEM((block_b, 1), jnp.float32)],  # running sumexp
        compiler_params=pltpu.CompilerParams(
            dimension_semantics=("parallel", "arbitrary"),
            vmem_limit_bytes=int(vmem_limit_bytes)),
    )(anchor, positive, negatives)

    return jnp.sum(partial_sums) / B


def _infonce_ref(anchor, positive, negatives, temperature=0.07):
    eps = 1e-12
    norm = lambda x: x / jnp.maximum(
        jnp.linalg.norm(x, axis=-1, keepdims=True), eps)
    a, p, n = norm(anchor), norm(positive), norm(negatives)
    pos = jnp.sum(a * p, axis=-1) / temperature
    neg = jnp.einsum("bd,bnd->bn", a, n) / temperature
    logits = jnp.concatenate([pos[:, None], neg], axis=1)
    lse = jax.scipy.special.logsumexp(logits, axis=-1)
    return jnp.mean(lse - logits[:, 0])


if __name__ == "__main__":
    key = jax.random.PRNGKey(0)

    # Test 1: small shapes from the module spec (single block).
    B, N, D = 2, 8, 32  # batch, num_negatives, embedding_dim
    k1, k2, k3, k4, k5, k6 = jax.random.split(key, 6)
    anchor = jax.random.normal(k1, (B, D), dtype=jnp.float32)
    positive = jax.random.normal(k2, (B, D), dtype=jnp.float32)
    negatives = jax.random.normal(k3, (B, N, D), dtype=jnp.float32)

    loss = infonce_loss(anchor, positive, negatives, temperature=0.07)
    jax.block_until_ready(loss)
    ref = _infonce_ref(anchor, positive, negatives, temperature=0.07)
    assert jnp.allclose(loss, ref, rtol=1e-5, atol=1e-5), (loss, ref)

    # Test 2: ragged batch + ragged N blocks (exercises the tiled grid,
    # online logsumexp, and the edge-block masking).
    B2, N2, D2 = 10, 20, 32
    anchor2 = jax.random.normal(k4, (B2, D2), dtype=jnp.float32)
    positive2 = jax.random.normal(k5, (B2, D2), dtype=jnp.float32)
    negatives2 = jax.random.normal(k6, (B2, N2, D2), dtype=jnp.float32)

    loss2 = infonce_loss(anchor2, positive2, negatives2, temperature=0.07,
                         block_b=8, block_n=8)
    jax.block_until_ready(loss2)
    ref2 = _infonce_ref(anchor2, positive2, negatives2, temperature=0.07)
    assert jnp.allclose(loss2, ref2, rtol=1e-5, atol=1e-5), (loss2, ref2)

    print("KERNEL_OK")
</pallas_src>

<mosaic_0001>
module attributes {stable_mosaic.version = 11 : i64} {
  func.func @_infonce_kernel(%arg0: i32, %arg1: i32, %arg2: memref<2x32xf32, #tpu.memory_space<vmem>>, %arg3: memref<2x32xf32, #tpu.memory_space<vmem>>, %arg4: memref<2x8x32xf32, #tpu.memory_space<vmem>>, %arg5: memref<1x1xf32, #tpu.memory_space<vmem>>, %arg6: memref<2x1xf32, #tpu.memory_space<vmem>>, %arg7: memref<2x1xf32, #tpu.memory_space<vmem>>) attributes {dimension_semantics = [#tpu.dimension_semantics<parallel>, #tpu.dimension_semantics<arbitrary>], iteration_bounds = array<i64: 1, 1>, scalar_prefetch = 0 : i64, scratch_operands = 2 : i64, tpu.core_type = #tpu.core_type<tc>, window_params = [{transform_indices = @transform_0, window_bounds = array<i64: 2, 32>}, {transform_indices = @transform_1, window_bounds = array<i64: 2, 32>}, {transform_indices = @transform_2, window_bounds = array<i64: 2, 8, 32>}, {transform_indices = @transform_3, window_bounds = array<i64: 1, 1>}]} {
    %cst = arith.constant 9.99999996E-13 : f32
    %cst_0 = arith.constant 9.99999996E-13 : f32
    %0 = arith.mulf %cst, %cst_0 : f32
    %c0_i32 = arith.constant 0 : i32
    %1 = arith.cmpi eq, %arg1, %c0_i32 : i32
    %2 = arith.extui %1 : i1 to i32
    %c0_i32_1 = arith.constant 0 : i32
    %3 = arith.cmpi ne, %2, %c0_i32_1 : i32
    scf.if %3 {
      %cst_26 = arith.constant 0xFF800000 : f32
      %54 = vector.broadcast %cst_26 : f32 to vector<2x1xf32>
      %c0_27 = arith.constant 0 : index
      %c0_28 = arith.constant 0 : index
      %55 = vector.load %arg6[%c0_27, %c0_28] : memref<2x1xf32, #tpu.memory_space<vmem>>, vector<2x1xf32>
      tpu.vector_store %arg6[%c0_27, %c0_28], %54 {strides = array<i32>} : memref<2x1xf32, #tpu.memory_space<vmem>>, vector<2x1xf32>,
      %cst_29 = arith.constant 0.000000e+00 : f32
      %56 = vector.broadcast %cst_29 : f32 to vector<2x1xf32>
      %c0_30 = arith.constant 0 : index
      %c0_31 = arith.constant 0 : index
      %57 = vector.load %arg7[%c0_30, %c0_31] : memref<2x1xf32, #tpu.memory_space<vmem>>, vector<2x1xf32>
      tpu.vector_store %arg7[%c0_30, %c0_31], %56 {strides = array<i32>} : memref<2x1xf32, #tpu.memory_space<vmem>>, vector<2x1xf32>,
    } else {
    }
    %c0 = arith.constant 0 : index
    %c0_2 = arith.constant 0 : index
    %4 = vector.load %arg2[%c0, %c0_2] : memref<2x32xf32, #tpu.memory_space<vmem>>, vector<2x32xf32>
    %5 = arith.mulf %4, %4 : vector<2x32xf32>
    %cst_3 = arith.constant dense<0.000000e+00> : vector<2xf32>
    %6 = vector.multi_reduction <add>, %5, %cst_3 [1] : vector<2x32xf32> to vector<2xf32>
    %7 = vector.shape_cast %6 : vector<2xf32> to vector<2x1xf32>
    %8 = vector.broadcast %0 : f32 to vector<2x1xf32>
    %9 = arith.maximumf %7, %8 : vector<2x1xf32>
    %10 = math.rsqrt %9 : vector<2x1xf32>
    %cst_4 = arith.constant 14.2857141 : f32
    %11 = vector.broadcast %cst_4 : f32 to vector<2x1xf32>
    %12 = arith.mulf %10, %11 : vector<2x1xf32>
    %13 = vector.broadcast %12 : vector<2x1xf32> to vector<2x32xf32>
    %14 = arith.mulf %4, %13 : vector<2x32xf32>
    %c0_5 = arith.constant 0 : index
    %c0_6 = arith.constant 0 : index
    %c0_7 = arith.constant 0 : index
    %15 = vector.load %arg4[%c0_5, %c0_6, %c0_7] : memref<2x8x32xf32, #tpu.memory_space<vmem>>, vector<2x8x32xf32>
    %16 = arith.mulf %15, %15 : vector<2x8x32xf32>
    %cst_8 = arith.constant dense<0.000000e+00> : vector<2x8xf32>
    %17 = vector.multi_reduction <add>, %16, %cst_8 [2] : vector<2x8x32xf32> to vector<2x8xf32>
    %18 = vector.shape_cast %14 : vector<2x32xf32> to vector<2x1x32xf32>
    %19 = vector.broadcast %18 : vector<2x1x32xf32> to vector<2x8x32xf32>
    %20 = arith.mulf %19, %15 : vector<2x8x32xf32>
    %cst_9 = arith.constant dense<0.000000e+00> : vector<2x8xf32>
    %21 = vector.multi_reduction <add>, %20, %cst_9 [2] : vector<2x8x32xf32> to vector<2x8xf32>
    %22 = vector.broadcast %0 : f32 to vector<2x8xf32>
    %23 = arith.maximumf %17, %22 : vector<2x8xf32>
    %24 = math.rsqrt %23 : vector<2x8xf32>
    %25 = arith.mulf %21, %24 : vector<2x8xf32>
    %c8_i32 = arith.constant 8 : i32
    %26 = arith.muli %arg1, %c8_i32 : i32
    %27 = tpu.iota {dimensions = array<i32: 1>} : vector<2x8xi32>
    %28 = vector.broadcast %26 : i32 to vector<2x8xi32>
    %29 = arith.addi %28, %27 : vector<2x8xi32>
    %c8_i32_10 = arith.constant 8 : i32
    %30 = vector.broadcast %c8_i32_10 : i32 to vector<2x8xi32>
    %31 = arith.cmpi slt, %29, %30 : vector<2x8xi32>
    %cst_11 = arith.constant 0xFF800000 : f32
    %32 = vector.broadcast %cst_11 : f32 to vector<2x8xf32>
    %33 = arith.select %31, %25, %32 : vector<2x8xi1>, vector<2x8xf32>
    %cst_12 = arith.constant dense<0xFF800000> : vector<2xf32>
    %34 = vector.multi_reduction <maximumf>, %33, %cst_12 [1] : vector<2x8xf32> to vector<2xf32>
    %35 = vector.shape_cast %34 : vector<2xf32> to vector<2x1xf32>
    %c0_13 = arith.constant 0 : index
    %c0_14 = arith.constant 0 : index
    %36 = vector.load %arg6[%c0_13, %c0_14] : memref<2x1xf32, #tpu.memory_space<vmem>>, vector<2x1xf32>
    %37 = arith.maximumf %36, %35 : vector<2x1xf32>
    %c0_15 = arith.constant 0 : index
    %c0_16 = arith.constant 0 : index
    %38 = vector.load %arg6[%c0_15, %c0_16] : memref<2x1xf32, #tpu.memory_space<vmem>>, vector<2x1xf32>
    %39 = arith.subf %38, %37 : vector<2x1xf32>
    %40 = math.exp %39 : vector<2x1xf32>
    %c0_17 = arith.constant 0 : index
    %c0_18 = arith.constant 0 : index
    %41 = vector.load %arg7[%c0_17, %c0_18] : memref<2x1xf32, #tpu.memory_space<vmem>>, vector<2x1xf32>
    %42 = arith.mulf %40, %41 : vector<2x1xf32>
    %43 = vector.broadcast %37 : vector<2x1xf32> to vector<2x8xf32>
    %44 = arith.subf %33, %43 : vector<2x8xf32>
    %45 = math.exp %44 : vector<2x8xf32>
    %cst_19 = arith.constant dense<0.000000e+00> : vector<2xf32>
    %46 = vector.multi_reduction <add>, %45, %cst_19 [1] : vector<2x8xf32> to vector<2xf32>
    %47 = vector.shape_cast %46 : vector<2xf32> to vector<2x1xf32>
    %48 = arith.addf %42, %47 : vector<2x1xf32>
    %c0_20 = arith.constant 0 : index
    %c0_21 = arith.constant 0 : index
    %49 = vector.load %arg7[%c0_20, %c0_21] : memref<2x1xf32, #tpu.memory_space<vmem>>, vector<2x1xf32>
    tpu.vector_store %arg7[%c0_20, %c0_21], %48 {strides = array<i32>} : memref<2x1xf32, #tpu.memory_space<vmem>>, vector<2x1xf32>,
    %c0_22 = arith.constant 0 : index
    %c0_23 = arith.constant 0 : index
    %50 = vector.load %arg6[%c0_22, %c0_23] : memref<2x1xf32, #tpu.memory_space<vmem>>, vector<2x1xf32>
    tpu.vector_store %arg6[%c0_22, %c0_23], %37 {strides = array<i32>} : memref<2x1xf32, #tpu.memory_space<vmem>>, vector<2x1xf32>,
    %c0_i32_24 = arith.constant 0 : i32
    %51 = arith.cmpi eq, %arg1, %c0_i32_24 : i32
    %52 = arith.extui %51 : i1 to i32
    %c0_i32_25 = arith.constant 0 : i32
    %53 = arith.cmpi ne, %52, %c0_i32_25 : i32
    scf.if %53 {
      %c0_26 = arith.constant 0 : index
      %c0_27 = arith.constant 0 : index
      %54 = vector.load %arg3[%c0_26, %c0_27] : memref<2x32xf32, #tpu.memory_space<vmem>>, vector<2x32xf32>
      %55 = arith.mulf %54, %54 : vector<2x32xf32>
      %cst_28 = arith.constant dense<0.000000e+00> : vector<2xf32>
      %56 = vector.multi_reduction <add>, %55, %cst_28 [1] : vector<2x32xf32> to vector<2xf32>
      %57 = vector.shape_cast %56 : vector<2xf32> to vector<2x1xf32>
      %58 = arith.mulf %14, %54 : vector<2x32xf32>
      %cst_29 = arith.constant dense<0.000000e+00> : vector<2xf32>
      %59 = vector.multi_reduction <add>, %58, %cst_29 [1] : vector<2x32xf32> to vector<2xf32>
      %60 = vector.shape_cast %59 : vector<2xf32> to vector<2x1xf32>
      %61 = vector.broadcast %0 : f32 to vector<2x1xf32>
      %62 = arith.maximumf %57, %61 : vector<2x1xf32>
      %63 = math.rsqrt %62 : vector<2x1xf32>
      %64 = arith.mulf %60, %63 : vector<2x1xf32>
      %c0_30 = arith.constant 0 : index
      %c0_31 = arith.constant 0 : index
      %65 = vector.load %arg6[%c0_30, %c0_31] : memref<2x1xf32, #tpu.memory_space<vmem>>, vector<2x1xf32>
      %66 = arith.maximumf %65, %64 : vector<2x1xf32>
      %67 = arith.subf %64, %66 : vector<2x1xf32>
      %68 = math.exp %67 : vector<2x1xf32>
      %c0_32 = arith.constant 0 : index
      %c0_33 = arith.constant 0 : index
      %69 = vector.load %arg7[%c0_32, %c0_33] : memref<2x1xf32, #tpu.memory_space<vmem>>, vector<2x1xf32>
      %c0_34 = arith.constant 0 : index
      %c0_35 = arith.constant 0 : index
      %70 = vector.load %arg6[%c0_34, %c0_35] : memref<2x1xf32, #tpu.memory_space<vmem>>, vector<2x1xf32>
      %71 = arith.subf %70, %66 : vector<2x1xf32>
      %72 = math.exp %71 : vector<2x1xf32>
      %73 = arith.mulf %69, %72 : vector<2x1xf32>
      %74 = arith.addf %68, %73 : vector<2x1xf32>
      %75 = math.log %74 : vector<2x1xf32>
      %76 = arith.addf %66, %75 : vector<2x1xf32>
      %77 = arith.subf %76, %64 : vector<2x1xf32>
      %c2_i32 = arith.constant 2 : i32
      %78 = arith.muli %arg0, %c2_i32 : i32
      %79 = tpu.iota {dimensions = array<i32: 0>} : vector<2x1xi32>
      %80 = vector.broadcast %78 : i32 to vector<2x1xi32>
      %81 = arith.addi %80, %79 : vector<2x1xi32>
      %c2_i32_36 = arith.constant 2 : i32
      %82 = vector.broadcast %c2_i32_36 : i32 to vector<2x1xi32>
      %83 = arith.cmpi slt, %81, %82 : vector<2x1xi32>
      %cst_37 = arith.constant 0.000000e+00 : f32
      %84 = vector.broadcast %cst_37 : f32 to vector<2x1xf32>
      %85 = arith.select %83, %77, %84 : vector<2x1xi1>, vector<2x1xf32>
      %cst_38 = arith.constant dense<0.000000e+00> : vector<1xf32>
      %86 = vector.multi_reduction <add>, %85, %cst_38 [0] : vector<2x1xf32> to vector<1xf32>
      %87 = vector.shape_cast %86 : vector<1xf32> to vector<1x1xf32>
      %c0_39 = arith.constant 0 : index
      %c0_40 = arith.constant 0 : index
      %88 = vector.load %arg5[%c0_39, %c0_40] : memref<1x1xf32, #tpu.memory_space<vmem>>, vector<1x1xf32>
      tpu.vector_store %arg5[%c0_39, %c0_40], %87 {strides = array<i32>} : memref<1x1xf32, #tpu.memory_space<vmem>>, vector<1x1xf32>,
    } else {
    }
    return
  }
  func.func @transform_0(%arg0: i32, %arg1: i32) -> (i32, i32) {
    %c0_i32 = arith.constant 0 : i32
    %c0_i32_0 = arith.constant 0 : i32
    return %arg0, %c0_i32 : i32, i32
  }
  func.func @transform_1(%arg0: i32, %arg1: i32) -> (i32, i32) {
    %c0_i32 = arith.constant 0 : i32
    %c0_i32_0 = arith.constant 0 : i32
    return %arg0, %c0_i32 : i32, i32
  }
  func.func @transform_2(%arg0: i32, %arg1: i32) -> (i32, i32, i32) {
    %c0_i32 = arith.constant 0 : i32
    %c0_i32_0 = arith.constant 0 : i32
    return %arg0, %arg1, %c0_i32 : i32, i32, i32
  }
  func.func @transform_3(%arg0: i32, %arg1: i32) -> (i32, i32) {
    %c0_i32 = arith.constant 0 : i32
    %c0_i32_0 = arith.constant 0 : i32
    return %arg0, %c0_i32 : i32, i32
  }
}

</mosaic_0001>

<bundles_post_ra>
// kernel: tpu_custom_call.1
= control target key start
LH: loop header
LB: loop body
LE: loop exit
PB: predicated region body
PF: predicated region fallthrough
CT: control target
= control target key end

     0   :  { %8 = vsyncpa [#allocation5], 0  ;;  %s433_s0 = inlined_call_operand.hbm [shape: f32[2,32], index: 0, kind: input, shape index: {}]   ;;  %s434_s1 = inlined_call_operand.hbm [shape: f32[2,32], index: 1, kind: input, shape index: {}]   ;;  %s435_s2 = inlined_call_operand.hbm [shape: f32[2,8,32], index: 2, kind: input, shape index: {}]   ;;  %s436_s3 = inlined_call_operand.hbm [shape: f32[1,1], index: 3, kind: output, shape index: {}]  }
   0x1   :  { %9 = vsyncpa [#allocation8], 0  ;;  %s27_s14 = sshll.u32 %s434_s1, 4  ;;  %s28_s14 = int_to_ptr.hbm [resolvable:$true] %s27_s14 }
   0x2   :  { %10 = vsyncpa [#allocation6], 0  ;;  %s376_s15 = smov [#allocation7]   ;;  %s16_s19 = sshll.u32 %s433_s0, 4  ;;  %s17_s19 = int_to_ptr.hbm [resolvable:$true] %s16_s19 }
   0x3   :  { %s29_s16 = sshll.u32 %s376_s15, 4  ;;  %s377_s20 = smov [#allocation4]   ;;  %s30_s16 = int_to_ptr.vmem [resolvable:$true] %s29_s16 }
   0x4   :  { %32 = dma.hbm_to_vmem [thread:$0]  %s28_s14, 32, %s30_s16, [#allocation8]  }
   0x5   :  { %s18_s21 = sshll.u32 %s377_s20, 4  ;;  %s37_s24 = sshll.u32 %s435_s2, 4  ;;  %s19_s21 = int_to_ptr.vmem [resolvable:$true] %s18_s21  ;;  %s38_s24 = int_to_ptr.hbm [resolvable:$true] %s37_s24 }
   0x6   :  { %21 = dma.hbm_to_vmem [thread:$0]  %s17_s19, 32, %s19_s21, [#allocation5]  }
   0x7   :  { %s378_s1 = smov [#allocation9]   ;;  %s379_s26 = smov 128  }
   0x8   :  { %s39_s25 = sshll.u32 %s378_s1, 4  ;;  %s380_s27 = smov 8   ;;  %s40_s25 = int_to_ptr.vmem [resolvable:$true] %s39_s25 }
   0x9   :  { %45 = dma.hbm_to_vmem [thread:$0]  %s38_s24, 256, %s40_s25, [#allocation8], %s379_s26, %s379_s26, %s380_s27  }
   0xa   :  { %370 = dma.done.wait [#allocation5], 32  }
   0xb   :  { %371 = vsyncadd [#allocation5], 4294967264 }
   0xc   :  { %372 = dma.done.wait [#allocation8], 288  }
   0xd   :  { %373 = vsyncadd [#allocation8], 4294967008  ;;  %v65_v0 = vld [vmem:[#allocation4] sm:$0x3]  ;;  %vm67_vm0 = vcmask 254976   ;;  %v85_v1 = vld [vmem:[#allocation9 + $0x8] sm:$0xff]  ;;  %v134_v47 = vlaneseq }
   0xe   :  { %vm88_vm1 = vcmask 261120   ;;  %v66_v2 = vmul.f32 %v65_v0, %v65_v0  ;;  %v87_v3 = vmul.f32 %v85_v1, %v85_v1  ;;  %v84_v4 = vld [vmem:[#allocation9] sm:$0xff]  ;;  %v176_v19 = vld [vmem:[#allocation7] sm:$0x3]  ;;  %vm62_vm5 = vcmask 1024   ;;  %s384_s0 = smov [#allocation10]  }
   0xf   :  { %v86_v7 = vmul.f32 %v84_v4, %v84_v4  ;;  %v177_v29 = vmul.f32 %v176_v19, %v176_v19  ;;  %v381_v43 = vmov -inf   ;;  %v135_v51 = vand.u32 127, %v134_v47  ;;  %s233_s2 = sshll.u32 %s384_s0, 4  ;;  %s235_s30 = sshll.u32 %s436_s3, 4  ;;  %s234_s2 = int_to_ptr.vmem [resolvable:$true] %s233_s2  ;;  %s236_s30 = int_to_ptr.hbm [resolvable:$true] %s235_s30 }
  0x10   :  { %v68_v5 = vsel %vm67_vm0, %v66_v2, 0.0  ;;  %v92_v6 = vsel %vm88_vm1, %v87_v3, 0.0  ;;  %63 = vst.msk [vmem:[#allocation2] sm:$0x3] %vm62_vm5, %v381_v43  ;;  %vm143_vm12 = vcmask 1041409   ;;  %vm147_vm14 = vcmask 58368  }
  0x11   :  { %69 = vadd.xlane.f32.xlu0 %v68_v5  ;;  %93 = vadd.xlane.f32.xlu1 %v92_v6  ;;  %v89_v8 = vsel %vm88_vm1, %v86_v7, 0.0  ;;  %v178_v30 = vsel %vm67_vm0, %v177_v29, 0.0  ;;  %vm138_vm13 = vcmp.lt.s32.totalorder %v135_v51, 8  ;;  %v382_v62 = vmov 0  }
  0x12   :  { %255 = vset.pattern.permute.xlu0 %v382_v62  ;;  %v383_v63 = vmov 0.0  }
  0x13   :  { %64 = vst.msk [vmem:[#allocation3] sm:$0x3] %vm62_vm5, %v383_v63 }
  0x19   :  { %90 = vadd.xlane.f32.xlu0 %v89_v8 }
  0x84   :  { %v70_v9 = vpop.xlane.xlu0 %69  ;;  %v94_v32 = vpop.xlane.xlu1 %93 }
  0x85   :  { %v71_v10 = vmax.f32 %v70_v9, 1e-24  ;;  %v110_v34 = vmax.f32 %v94_v32, 1e-24 }
  0x87   :  { %256 = vrsqrt.f32 %v71_v10  ;;  %vm78_vm3 = vweird.f32 %v71_v10  ;;  %vm127_vm8 = vweird.f32 %v110_v34 }
  0x8c   :  { %v91_v31 = vpop.xlane.xlu0 %90 }
  0x8d   :  { %v257_v11 = vpop.eup %256  ;;  %v109_v33 = vmax.f32 %v91_v31, 1e-24 }
  0x8e   :  { %v73_v12 = vmul.f32 %v257_v11, %v71_v10  ;;  %vm79_vm2 = vweird.f32 %v257_v11 }
  0x8f   :  { %vm80_vm4 = vmor %vm78_vm3, %vm79_vm2  ;;  %258 = vrsqrt.f32 %v109_v33  ;;  %vm117_vm6 = vweird.f32 %v109_v33  ;;  %vm226_vm3 = vcmask 0  }
  0x90   :  { %v74_v13 = vmul.f32 %v257_v11, %v73_v12  ;;  %260 = vrsqrt.f32 %v110_v34 }
  0x92   :  { %v75_v14 = vmul.f32 0.5, %v74_v13 }
  0x94   :  { %v76_v15 = vsub.f32 1.5, %v75_v14 }
  0x95   :  { %v259_v35 = vpop.eup %258 }
  0x96   :  { %v77_v16 = vmul.f32 %v257_v11, %v76_v15  ;;  %v261_v36 = vpop.eup %260  ;;  %v112_v37 = vmul.f32 %v259_v35, %v109_v33  ;;  %vm118_vm7 = vweird.f32 %v259_v35 }
  0x97   :  { %v122_v38 = vmul.f32 %v261_v36, %v110_v34  ;;  %vm128_vm9 = vweird.f32 %v261_v36  ;;  %vm119_vm10 = vmor %vm117_vm6, %vm118_vm7 }
  0x98   :  { %v81_v17 = vsel %vm80_vm4, %v257_v11, %v77_v16  ;;  %v113_v39 = vmul.f32 %v259_v35, %v112_v37  ;;  %vm129_vm11 = vmor %vm127_vm8, %vm128_vm9 }
  0x99   :  { %v82_v18 = vmul.f32 14.285714, %v81_v17  ;;  %v123_v40 = vmul.f32 %v261_v36, %v122_v38  ;;  %v214_v38 = vshrl.u32 %v134_v47, 7 }
  0x9a   :  { %v114_v41 = vmul.f32 0.5, %v113_v39 }
  0x9b   :  { %v83_v20 = vmul.f32 %v82_v18, %v65_v0  ;;  %v124_v42 = vmul.f32 0.5, %v123_v40  ;;  %v151_v0 = vld [vmem:[#allocation2] sm:$0x3]  ;;  %vm217_vm2 = vcmp.lt.s32.totalorder %v214_v38, 2 }
  0x9c   :  { %v115_v44 = vsub.f32 1.5, %v114_v41 }
  0x9d   :  { %v97_v21 = vperm.slane %v83_v20, 0  ;;  %v96_v22 = vrot.slane %v83_v20, 1  ;;  %v181_v23 = vmul.f32 %v176_v19, %v83_v20  ;;  %v125_v45 = vsub.f32 1.5, %v124_v42 }
  0x9e   :  { %v116_v46 = vmul.f32 %v259_v35, %v115_v44 }
  0x9f   :  { %v101_v24 = vmul.f32 %v97_v21, %v84_v4  ;;  %v98_v25 = vperm.slane %v96_v22, 0  ;;  %v126_v48 = vmul.f32 %v261_v36, %v125_v45  ;;  %v182_v61 = vsel %vm67_vm0, %v181_v23, 0.0 }
  0xa0   :  { %v120_v50 = vsel %vm119_vm10, %v259_v35, %v116_v46 }
  0xa1   :  { %v103_v26 = vsel %vm88_vm1, %v101_v24, 0.0  ;;  %v102_v27 = vmul.f32 %v98_v25, %v85_v1  ;;  %v130_v53 = vsel %vm129_vm11, %v261_v36, %v126_v48  ;;  %v156_v25 = vld [vmem:[#allocation3] sm:$0x3] }
  0xa2   :  { %104 = vadd.xlane.f32.xlu1 %v103_v26 }
  0xa3   :  { %v106_v28 = vsel %vm88_vm1, %v102_v27, 0.0 }
  0xa4   :  { %107 = vadd.xlane.f32.xlu2 %v106_v28 }
  0xaa   :  { %179 = vadd.xlane.f32.xlu1 %v178_v30 }
 0x115   :  { %v105_v49 = vpop.xlane.xlu1 %104 }
 0x116   :  { %v131_v52 = vmul.f32 %v120_v50, %v105_v49 }
 0x117   :  { %v108_v54 = vpop.xlane.xlu2 %107 }
 0x118   :  { %v132_v55 = vmul.f32 %v130_v53, %v108_v54  ;;  %v141_v56 = vperm.slane %v131_v52, %v135_v51 }
 0x11a   :  { %v142_v57 = vperm.slane %v132_v55, %v135_v51 }
 0x11c   :  { %v144_v58 = vsel %vm143_vm12, %v142_v57, %v141_v56 }
 0x11d   :  { %v146_v59 = vsel %vm138_vm13, %v144_v58, -inf  ;;  %v180_v9 = vpop.xlane.xlu1 %179 }
 0x11e   :  { %v148_v60 = vsel %vm147_vm14, %v146_v59, -inf  ;;  %v185_v10 = vmax.f32 %v180_v9, 1e-24 }
 0x11f   :  { %149 = vmax.xlane.f32.xlu2 %v148_v60 }
 0x120   :  { %vm192_vm15 = vweird.f32 %v185_v10 }
 0x127   :  { %183 = vadd.xlane.f32.xlu2 %v182_v61 }
 0x192   :  { %v150_v1 = vpop.xlane.xlu2 %149 }
 0x193   :  { %v152_v2 = vmax.f32 %v151_v0, %v150_v1 }
 0x195   :  { %v153_v3 = vsub.f32 %v151_v0, %v152_v2  ;;  %172 = vst.msk [vmem:[#allocation2] sm:$0x3] %vm62_vm5, %v152_v2  ;;  %160 = vperm.xlu0 %255, %v152_v2  }
 0x197   :  { %v154_v19 = vmul.f32 1.442695, %v153_v3 }
 0x19a   :  { %v184_v18 = vpop.xlane.xlu2 %183 }
 0x19c   :  { %v197_v21 = vld [vmem:[#allocation2] sm:$0x3] }
 0x207   :  { %v161_v4 = vpop.permute.xlu0 %160 }
 0x208   :  { %v163_v5 = vsub.f32 %v146_v59, %v161_v4 }
 0x20a   :  { %v164_v6 = vmul.f32 1.442695, %v163_v5 }
 0x20c   :  { %262 = vpow2.f32 %v164_v6 }
 0x20d   :  { %264 = vrsqrt.f32 %v185_v10 }
 0x20e   :  { %266 = vpow2.f32 %v154_v19 }
 0x212   :  { %v263_v7 = vpop.eup %262 }
 0x213   :  { %v166_v8 = vsel %vm147_vm14, %v263_v7, 0.0  ;;  %v265_v11 = vpop.eup %264 }
 0x214   :  { %167 = vadd.xlane.f32.xlu1 %v166_v8  ;;  %v187_v12 = vmul.f32 %v265_v11, %v185_v10  ;;  %vm193_vm0 = vweird.f32 %v265_v11  ;;  %v267_v23 = vpop.eup %266 }
 0x215   :  { %vm194_vm1 = vmor %vm192_vm15, %vm193_vm0  ;;  %v157_v27 = vmul.f32 %v267_v23, %v156_v25 }
 0x216   :  { %v188_v13 = vmul.f32 %v265_v11, %v187_v12 }
 0x218   :  { %v189_v14 = vmul.f32 0.5, %v188_v13 }
 0x21a   :  { %v190_v15 = vsub.f32 1.5, %v189_v14 }
 0x21c   :  { %v191_v16 = vmul.f32 %v265_v11, %v190_v15 }
 0x21e   :  { %v195_v17 = vsel %vm194_vm1, %v265_v11, %v191_v16 }
 0x21f   :  { %v196_v20 = vmul.f32 %v195_v17, %v184_v18 }
 0x221   :  { %v198_v22 = vmax.f32 %v197_v21, %v196_v20 }
 0x223   :  { %v203_v24 = vsub.f32 %v197_v21, %v198_v22  ;;  %v199_v26 = vsub.f32 %v196_v20, %v198_v22 }
 0x225   :  { %v204_v28 = vmul.f32 1.442695, %v203_v24  ;;  %v200_v31 = vmul.f32 1.442695, %v199_v26 }
 0x227   :  { %268 = vpow2.f32 %v204_v28 }
 0x228   :  { %270 = vpow2.f32 %v200_v31 }
 0x22d   :  { %v269_v32 = vpop.eup %268 }
 0x22e   :  { %v271_v35 = vpop.eup %270 }
 0x287   :  { %v168_v29 = vpop.xlane.xlu1 %167 }
 0x288   :  { %v169_v30 = vadd.f32 %v168_v29, %v157_v27 }
 0x28a   :  { %171 = vst.msk [vmem:[#allocation3] sm:$0x3] %vm62_vm5, %v169_v30 }
 0x291   :  { %v202_v33 = vld [vmem:[#allocation3] sm:$0x3] }
 0x292   :  { %v206_v34 = vmul.f32 %v269_v32, %v202_v33 }
 0x294   :  { %v207_v36 = vadd.f32 %v271_v35, %v206_v34 }
 0x296   :  { %272 = vlog2.f32 %v207_v36 }
 0x29c   :  { %v273_v37 = vpop.eup %272 }
 0x29d   :  { %v209_v39 = vmul.f32 0.6931472, %v273_v37 }
 0x29f   :  { %v210_v40 = vadd.f32 %v209_v39, %v198_v22 }
 0x2a1   :  { %v211_v41 = vsub.f32 %v210_v40, %v196_v20 }
 0x2a3   :  { %v218_v42 = vsel %vm217_vm2, %v211_v41, 0.0 }
 0x2a4   :  { %v219_v43 = vsel %vm62_vm5, %v218_v42, 0.0 }
 0x2a5   :  { %v220_v44 = vrot.slane %v219_v43, 4 }
 0x2a7   :  { %v221_v45 = vadd.f32 %v220_v44, %v219_v43 }
 0x2a9   :  { %v222_v46 = vrot.slane %v221_v45, 2 }
 0x2ab   :  { %v223_v48 = vadd.f32 %v222_v46, %v221_v45 }
 0x2ad   :  { %v224_v49 = vrot.slane %v223_v48, 1 }
 0x2af   :  { %v225_v47 = vadd.f32 %v224_v49, %v223_v48 }
 0x2b1   :  { %227 = vst.msk [vmem:[#allocation10] sm:$0x1] %vm226_vm3, %v225_v47 }
 0x2b2   :  { %238 = dma.vmem_to_hbm [thread:$0]  %s234_s2, 16, %s236_s30, [#allocation6]  }
 0x2b3   :  { %374 = dma.done.wait [#allocation6], 16  }
 0x2b4   :  { %375 = vsyncadd [#allocation6], 4294967280 }
 0x2b5   :  { %243 = vsyncpa [#allocation5], 1 }
 0x2b6   :  { %244 = vsyncpa [#allocation8], 1 }
 0x2b7   :  { %245 = vsyncpa [#allocation6], 1 }

</bundles_post_ra>
